<compile_context>
chip_gen: v7x
topology: tpu7x:2x2x1
jax: 0.10.0
libtpu: 0.0.40
codegen_flags: <defaults>
</compile_context>

<pallas_src>
import numpy as np
import jax
import jax.numpy as jnp
from jax import lax
from jax.experimental import pallas as pl
from jax.experimental.pallas import tpu as pltpu


# ----------------------------- configuration --------------------------------
BATCH    = 2
INPUT_C  = 4          # input_chanels
INPUT_H  = 16         # input_image_height
INPUT_W  = 16         # input_image_width

KERNEL_SIZES  = [5, 5]       # conv_layers_kernel_sizes
CONV_CHANNELS = [8, 16]      # conv_layers_channels (input channels prepended in the module)
CONV_STRIDES  = [1, 1]
POOL_SIZES    = [2, 2]       # pool_kernel_sizes == pool_kernel_strides, pool_type='avg'
LATENT_DIM    = 32           # latent_state_dim

# activations.getActivation(...) stand-ins
ACT_HIDDEN = lambda x: jnp.maximum(x, 0.0)   # activation        = 'relu'
ACT_OUTPUT = jnp.tanh                        # activation_output = 'tanh'
# NOTE: per the reference module, the LAST conv block uses activation_output.


def get_same_padding(stride, image_size, filter_size):
    half_pad = (stride - 1) * image_size - stride + filter_size
    assert half_pad % 2 == 0, "padding must be even"
    pad = half_pad // 2
    assert pad <= image_size / 2, "padding too large"
    return pad


# ------------------------------ derived geometry -----------------------------
K = KERNEL_SIZES[0]
C1, C2, C3 = INPUT_C, CONV_CHANNELS[0], CONV_CHANNELS[1]
assert KERNEL_SIZES == [K, K] and CONV_STRIDES == [1, 1] and POOL_SIZES == [2, 2]

# the module computes every layer's padding from the ORIGINAL image size
PAD1 = get_same_padding(1, INPUT_W, K)               # 2
PAD2 = get_same_padding(1, INPUT_W, K)               # 2
H1P, W1P = INPUT_H + 2 * PAD1, INPUT_W + 2 * PAD1    # 20, 20   padded input, block 1
H1O, W1O = H1P - K + 1, W1P - K + 1                  # 16, 16   conv-1 output
H2,  W2  = H1O // 2, W1O // 2                        # 8,  8    after pool 1
H2P, W2P = H2 + 2 * PAD2, W2 + 2 * PAD2              # 12, 12   padded input, block 2
H2O, W2O = H2P - K + 1, W2P - K + 1                  # 8,  8    conv-2 output
H3,  W3  = H2O // 2, W2O // 2                        # 4,  4    after pool 2
FEAT = C3 * H3 * W3                                  # 256      Linear in_features

# in-kernel layout: rows = (n, h), lanes = (w, c)  -> conv outputs are 128 lanes wide
ROWS1     = BATCH * H1O        # 32   conv-1 stacked-LHS rows (exact, no garbage rows)
LANES1    = K * W1P * C1       # 400  conv-1 stacked contraction depth
HS2       = H2P                # 12   per-image row stride of the padded block-2 input
ROWS2     = BATCH * HS2        # 24   conv-2 stacked-LHS rows
XP2_ROWS  = 32                 # ROWS2 + (K-1) rounded up to a multiple of 8
XP2_LANES = 128                # W2P*C2 = 96 data lanes + 32 zero lanes -> 128-aligned lane concat
LANES2    = K * XP2_LANES      # 640  conv-2 stacked contraction depth


# ------------------------------ fused Pallas kernel --------------------------
def _fused_encoder_kernel(lhs1_ref, w1s_ref, p1l_ref, p1r_ref, b2pad_ref,
                          w2s_ref, p2l_ref, p2r_ref, b2row_ref,
                          vrs_ref, dmask_ref, rsel_ref, ssum_ref, blin_ref,
                          out_ref):
    f32, bf16 = jnp.float32, jnp.bfloat16
    dot = lambda a, b: jnp.dot(a, b, preferred_element_type=f32)

    # ---- conv block 1: ONE stacked-contraction MXU matmul (kh folded into lanes) ----
    y1 = dot(lhs1_ref[...], w1s_ref[...])                        # (32, 128) f32, pre-bias

    # ---- fused AvgPool2d(2,2) [0.25 in p1l] + bias + ReLU + ZeroPad2d for block 2 ----
    hp1 = dot(p1l_ref[...], y1.astype(bf16)).astype(bf16)        # (32, 128)  pooled over h
    xp2 = ACT_HIDDEN(dot(hp1, p1r_ref[...]) + b2pad_ref[...])    # (32, 128)  padded block-2 input

    # ---- conv block 2: stack K row-shifted windows along 128-aligned lanes, one dot ----
    lhs2 = jnp.concatenate([xp2[kh:kh + ROWS2, :] for kh in range(K)], axis=1)   # (24, 640)
    y2 = dot(lhs2.astype(bf16), w2s_ref[...])                    # (24, 128) f32, pre-bias

    # ---- fused AvgPool2d(2,2) + bias + activation_output (last conv block) ----
    hp2 = dot(p2l_ref[...], y2.astype(bf16)).astype(bf16)        # (8, 128)
    a2 = ACT_OUTPUT(dot(hp2, p2r_ref[...]) + b2row_ref[...])     # (8, 64) f32

    # ---- Flatten(C,H,W) + Linear: one lane-stacked dot + diag-block mask + 2 reduces ----
    t = dot(a2.astype(bf16), vrs_ref[...]) * dmask_ref[...]      # (8, 128)
    o = dot(dot(rsel_ref[...], t), ssum_ref[...]) + blin_ref[...]    # (2, 32)
    out_ref[...] = ACT_OUTPUT(o)


@jax.jit
def conv_mlp_encoder_forward(x_nchw, params):
    """x_nchw: (N, C, H, W) float32 -- same convention as the PyTorch module."""
    # NCHW -> NHWC -> zero-pad -> stack the K row-shifted windows along the
    # contraction axis and pre-cast to bf16 (layout plumbing in the wrapper, so
    # the kernel's first matmul needs no in-kernel shifting or casting).
    x = jnp.transpose(x_nchw, (0, 2, 3, 1)).astype(jnp.float32)          # (N, 16, 16, 4)
    xp = jnp.pad(x, ((0, 0), (PAD1, PAD1), (PAD1, PAD1), (0, 0)))        # (N, 20, 20, 4)
    wins = jnp.stack([xp[:, kh:kh + H1O, :, :] for kh in range(K)], axis=2)   # (N, 16, K, 20, 4)
    lhs1 = wins.reshape(ROWS1, LANES1).astype(jnp.bfloat16)              # (32, 400) bf16

    vmem = pl.BlockSpec(memory_space=pltpu.MemorySpace.VMEM)
    return pl.pallas_call(
        _fused_encoder_kernel,
        out_shape=jax.ShapeDtypeStruct((BATCH, LATENT_DIM), jnp.float32),
        in_specs=[vmem] * 14,
        out_specs=vmem,
    )(lhs1, params["w1s"], params["p1l"], params["p1r"], params["b2pad"],
      params["w2s"], params["p2l"], params["p2r"], params["b2row"],
      params["vrs"], params["dmask"], params["rsel"], params["ssum"],
      params["blin"])


# ------------------------------ parameters -----------------------------------
def _lower_conv_stacked(wt, w_out, lane_stride):
    """Block-Toeplitz lowering with kernel-height stacked into the contraction:
       weight[kh*lane_stride + wp*cin + ci, wo*cout + co] = wt[co, ci, kh, wp-wo]."""
    cout, cin, k, _ = wt.shape
    low = np.zeros((k, lane_stride, w_out * cout), np.float32)
    for kh in range(k):
        for wo in range(w_out):
            for kw in range(k):
                wp = wo + kw
                low[kh, wp * cin:(wp + 1) * cin, wo * cout:(wo + 1) * cout] = wt[:, :, kh, kw].T
    return low.reshape(k * lane_stride, w_out * cout)


def init_params(key):
    """Torch-layout parameters + kernel-ready (lowered/stacked) forms and all
    host-precomputed selection matrices, built once."""
    keys = jax.random.split(key, 6)
    b1v = 1.0 / np.sqrt(C1 * K * K)
    w1 = jax.random.uniform(keys[0], (C2, C1, K, K), jnp.float32, -b1v, b1v)
    b1 = jax.random.uniform(keys[1], (C2,), jnp.float32, -b1v, b1v)
    b2v = 1.0 / np.sqrt(C2 * K * K)
    w2 = jax.random.uniform(keys[2], (C3, C2, K, K), jnp.float32, -b2v, b2v)
    b2 = jax.random.uniform(keys[3], (C3,), jnp.float32, -b2v, b2v)
    blv = 1.0 / np.sqrt(FEAT)
    wl = jax.random.uniform(keys[4], (LATENT_DIM, FEAT), jnp.float32, -blv, blv)
    bl = jax.random.uniform(keys[5], (LATENT_DIM,), jnp.float32, -blv, blv)

    w1n, b1n = np.asarray(w1), np.asarray(b1)
    w2n, b2n = np.asarray(w2), np.asarray(b2)
    wln, bln = np.asarray(wl), np.asarray(bl)

    w1s = _lower_conv_stacked(w1n, W1O, W1P * C1)     # (400, 128)
    w2s = _lower_conv_stacked(w2n, W2O, XP2_LANES)    # (640, 128), lanes 96..127 of each kh block zero

    # pool-1 + conv-1 bias + ZeroPad2d(block 2), fused (0.25 folded into p1l, bias at interior only)
    p1l = np.zeros((XP2_ROWS, ROWS1), np.float32)
    b2pad = np.zeros((XP2_ROWS, XP2_LANES), np.float32)
    for n in range(BATCH):
        for i in range(H2):
            for dh in range(2):
                p1l[n * HS2 + PAD2 + i, n * H1O + 2 * i + dh] = 0.25
            for j in range(W2):
                b2pad[n * HS2 + PAD2 + i, (PAD2 + j) * C2:(PAD2 + j) * C2 + C2] = b1n
    p1r = np.zeros((W1O * C2, XP2_LANES), np.float32)
    for j in range(W2):
        for dw in range(2):
            for c in range(C2):
                p1r[(2 * j + dw) * C2 + c, (PAD2 + j) * C2 + c] = 1.0

    # pool-2 (0.25 folded into p2l), conv-2 bias added after pooling (row-broadcast)
    p2l = np.zeros((BATCH * H3, ROWS2), np.float32)
    for n in range(BATCH):
        for i in range(H3):
            for dh in range(2):
                p2l[n * H3 + i, n * HS2 + 2 * i + dh] = 0.25
    p2r = np.zeros((W2O * C3, W3 * C3), np.float32)
    for j in range(W3):
        for dw in range(2):
            for c in range(C3):
                p2r[(2 * j + dw) * C3 + c, j * C3 + c] = 1.0
    b2row = np.tile(b2n, W3)[None, :]                 # (1, 64)

    # Flatten(C,H,W) + Linear: lane-stacked weight (column block i holds the h-index-i slice),
    # diagonal-block mask and the two tiny reduce matrices.
    vrs = np.zeros((W3 * C3, H3 * LATENT_DIM), np.float32)
    for i in range(H3):
        for j in range(W3):
            for c in range(C3):
                vrs[j * C3 + c, i * LATENT_DIM:(i + 1) * LATENT_DIM] = wln[:, c * H3 * W3 + i * W3 + j]
    dmask = np.zeros((BATCH * H3, H3 * LATENT_DIM), np.float32)
    rsel = np.zeros((BATCH, BATCH * H3), np.float32)
    for n in range(BATCH):
        for i in range(H3):
            dmask[n * H3 + i, i * LATENT_DIM:(i + 1) * LATENT_DIM] = 1.0
        rsel[n, n * H3:(n + 1) * H3] = 1.0
    ssum = np.zeros((H3 * LATENT_DIM, LATENT_DIM), np.float32)
    for i in range(H3):
        ssum[i * LATENT_DIM:(i + 1) * LATENT_DIM, :] = np.eye(LATENT_DIM, dtype=np.float32)

    bf16, f32 = jnp.bfloat16, jnp.float32
    return {
        # kernel-ready operands (bf16 where they feed the fast MXU path; masks exact in bf16)
        "w1s": jnp.asarray(w1s, bf16), "p1l": jnp.asarray(p1l, bf16),
        "p1r": jnp.asarray(p1r, bf16), "b2pad": jnp.asarray(b2pad, f32),
        "w2s": jnp.asarray(w2s, bf16), "p2l": jnp.asarray(p2l, bf16),
        "p2r": jnp.asarray(p2r, bf16), "b2row": jnp.asarray(b2row, f32),
        "vrs": jnp.asarray(vrs, bf16), "dmask": jnp.asarray(dmask, f32),
        "rsel": jnp.asarray(rsel, f32), "ssum": jnp.asarray(ssum, f32),
        "blin": jnp.asarray(bln[None, :], f32),
        # raw torch-layout parameters (pure-JAX reference)
        "w1": w1, "b1": b1, "w2": w2, "b2": b2, "wl": wl, "bl": bl,
    }


# ------------------------------ pure-JAX reference ---------------------------
def reference_forward(x_nchw, params):
    """XLA reference with the same bf16 operand rounding points the kernel applies
    (float64 of the original module is emulated as bf16 operands + f32 accumulation)."""
    hi = lax.Precision.HIGHEST
    q = lambda v: v.astype(jnp.bfloat16).astype(jnp.float32)

    def conv_block(x_nhwc, w, b, pad, act):
        xq = jnp.pad(q(x_nhwc), ((0, 0), (pad, pad), (pad, pad), (0, 0)))
        wq = jnp.transpose(q(w), (2, 3, 1, 0))                  # -> HWIO
        y = lax.conv_general_dilated(xq, wq, (1, 1), "VALID",
                                     dimension_numbers=("NHWC", "HWIO", "NHWC"),
                                     precision=hi)
        y = q(y)                                                # kernel pools bf16 conv outputs
        n, h, w_, c = y.shape
        p = y.reshape(n, h // 2, 2, w_ // 2, 2, c).mean(axis=(2, 4))   # AvgPool2d(2,2)
        return act(p + b[None, None, None, :])                  # bias after pool == Conv2d bias

    x = jnp.transpose(x_nchw, (0, 2, 3, 1)).astype(jnp.float32)
    a1 = conv_block(x, params["w1"], params["b1"], PAD1, ACT_HIDDEN)
    a2 = conv_block(a1, params["w2"], params["b2"], PAD2, ACT_OUTPUT)   # last block: act_output
    feat = jnp.transpose(a2, (0, 3, 1, 2)).reshape(x.shape[0], -1)      # Flatten(C,H,W)
    return ACT_OUTPUT(jnp.matmul(q(feat), q(params["wl"]).T, precision=hi)
                      + params["bl"][None, :])


# ---------------------------------- main --------------------------------------
if __name__ == "__main__":
    key = jax.random.PRNGKey(0)
    k_x, k_p = jax.random.split(key)
    x = jax.random.normal(k_x, (BATCH, INPUT_C, INPUT_H, INPUT_W), jnp.float32)
    params = init_params(k_p)

    out = jax.block_until_ready(conv_mlp_encoder_forward(x, params))

    assert out.shape == (BATCH, LATENT_DIM), out.shape
    assert bool(jnp.all(jnp.isfinite(out)))
    assert bool(jnp.all(jnp.abs(out) <= 1.0))        # tanh output activation

    ref = jax.block_until_ready(reference_forward(x, params))
    err = float(jnp.max(jnp.abs(out - ref)))
    # tolerance reflects the bf16-operand emulation of the module's float64 math
    assert err < 2e-2, f"max |kernel - reference| = {err}"

    print("KERNEL_OK")
</pallas_src>

<mosaic_0001>
module attributes {stable_mosaic.version = 11 : i64} {
  func.func @_fused_encoder_kernel(%arg0: memref<32x400xbf16, #tpu.memory_space<vmem>>, %arg1: memref<400x128xbf16, #tpu.memory_space<vmem>>, %arg2: memref<32x32xbf16, #tpu.memory_space<vmem>>, %arg3: memref<128x128xbf16, #tpu.memory_space<vmem>>, %arg4: memref<32x128xf32, #tpu.memory_space<vmem>>, %arg5: memref<640x128xbf16, #tpu.memory_space<vmem>>, %arg6: memref<8x24xbf16, #tpu.memory_space<vmem>>, %arg7: memref<128x64xbf16, #tpu.memory_space<vmem>>, %arg8: memref<1x64xf32, #tpu.memory_space<vmem>>, %arg9: memref<64x128xbf16, #tpu.memory_space<vmem>>, %arg10: memref<8x128xf32, #tpu.memory_space<vmem>>, %arg11: memref<2x8xf32, #tpu.memory_space<vmem>>, %arg12: memref<128x32xf32, #tpu.memory_space<vmem>>, %arg13: memref<1x32xf32, #tpu.memory_space<vmem>>, %arg14: memref<2x32xf32, #tpu.memory_space<vmem>>) attributes {dimension_semantics = [], scalar_prefetch = 0 : i64, scratch_operands = 0 : i64, tpu.core_type = #tpu.core_type<tc>} {
    %c0 = arith.constant 0 : index
    %c0_0 = arith.constant 0 : index
    %0 = vector.load %arg0[%c0, %c0_0] : memref<32x400xbf16, #tpu.memory_space<vmem>>, vector<32x400xbf16>
    %c0_1 = arith.constant 0 : index
    %c0_2 = arith.constant 0 : index
    %1 = vector.load %arg1[%c0_1, %c0_2] : memref<400x128xbf16, #tpu.memory_space<vmem>>, vector<400x128xbf16>
    %cst = arith.constant dense<0.000000e+00> : vector<32x128xf32>
    %2 = tpu.matmul %0, %1, %cst {dimension_numbers = #tpu.dot_dimension_numbers<[1], [0], [0], [1], [0, 0, 1, 1], [], []>} : vector<32x400xbf16>, vector<400x128xbf16>, vector<32x128xf32> -> vector<32x128xf32>
    %c0_3 = arith.constant 0 : index
    %c0_4 = arith.constant 0 : index
    %3 = vector.load %arg2[%c0_3, %c0_4] : memref<32x32xbf16, #tpu.memory_space<vmem>>, vector<32x32xbf16>
    %4 = arith.truncf %2 : vector<32x128xf32> to vector<32x128xbf16>
    %cst_5 = arith.constant dense<0.000000e+00> : vector<32x128xf32>
    %5 = tpu.matmul %3, %4, %cst_5 {dimension_numbers = #tpu.dot_dimension_numbers<[1], [0], [0], [1], [0, 0, 1, 1], [], []>} : vector<32x32xbf16>, vector<32x128xbf16>, vector<32x128xf32> -> vector<32x128xf32>
    %6 = arith.truncf %5 : vector<32x128xf32> to vector<32x128xbf16>
    %c0_6 = arith.constant 0 : index
    %c0_7 = arith.constant 0 : index
    %7 = vector.load %arg3[%c0_6, %c0_7] : memref<128x128xbf16, #tpu.memory_space<vmem>>, vector<128x128xbf16>
    %cst_8 = arith.constant dense<0.000000e+00> : vector<32x128xf32>
    %8 = tpu.matmul %6, %7, %cst_8 {dimension_numbers = #tpu.dot_dimension_numbers<[1], [0], [0], [1], [0, 0, 1, 1], [], []>} : vector<32x128xbf16>, vector<128x128xbf16>, vector<32x128xf32> -> vector<32x128xf32>
    %c0_9 = arith.constant 0 : index
    %c0_10 = arith.constant 0 : index
    %9 = vector.load %arg4[%c0_9, %c0_10] : memref<32x128xf32, #tpu.memory_space<vmem>>, vector<32x128xf32>
    %10 = arith.addf %8, %9 : vector<32x128xf32>
    %cst_11 = arith.constant 0.000000e+00 : f32
    %11 = vector.broadcast %cst_11 : f32 to vector<32x128xf32>
    %12 = arith.maximumf %10, %11 : vector<32x128xf32>
    %13 = vector.extract_strided_slice %12 {offsets = [0, 0], sizes = [24, 128], strides = [1, 1]} : vector<32x128xf32> to vector<24x128xf32>
    %14 = vector.extract_strided_slice %12 {offsets = [1, 0], sizes = [24, 128], strides = [1, 1]} : vector<32x128xf32> to vector<24x128xf32>
    %15 = vector.extract_strided_slice %12 {offsets = [2, 0], sizes = [24, 128], strides = [1, 1]} : vector<32x128xf32> to vector<24x128xf32>
    %16 = vector.extract_strided_slice %12 {offsets = [3, 0], sizes = [24, 128], strides = [1, 1]} : vector<32x128xf32> to vector<24x128xf32>
    %17 = vector.extract_strided_slice %12 {offsets = [4, 0], sizes = [24, 128], strides = [1, 1]} : vector<32x128xf32> to vector<24x128xf32>
    %18 = tpu.concatenate %13, %14, %15, %16, %17 in 1 : vector<24x128xf32>, vector<24x128xf32>, vector<24x128xf32>, vector<24x128xf32>, vector<24x128xf32> -> vector<24x640xf32>
    %19 = arith.truncf %18 : vector<24x640xf32> to vector<24x640xbf16>
    %c0_12 = arith.constant 0 : index
    %c0_13 = arith.constant 0 : index
    %20 = vector.load %arg5[%c0_12, %c0_13] : memref<640x128xbf16, #tpu.memory_space<vmem>>, vector<640x128xbf16>
    %cst_14 = arith.constant dense<0.000000e+00> : vector<24x128xf32>
    %21 = tpu.matmul %19, %20, %cst_14 {dimension_numbers = #tpu.dot_dimension_numbers<[1], [0], [0], [1], [0, 0, 1, 1], [], []>} : vector<24x640xbf16>, vector<640x128xbf16>, vector<24x128xf32> -> vector<24x128xf32>
    %c0_15 = arith.constant 0 : index
    %c0_16 = arith.constant 0 : index
    %22 = vector.load %arg6[%c0_15, %c0_16] : memref<8x24xbf16, #tpu.memory_space<vmem>>, vector<8x24xbf16>
    %23 = arith.truncf %21 : vector<24x128xf32> to vector<24x128xbf16>
    %cst_17 = arith.constant dense<0.000000e+00> : vector<8x128xf32>
    %24 = tpu.matmul %22, %23, %cst_17 {dimension_numbers = #tpu.dot_dimension_numbers<[1], [0], [0], [1], [0, 0, 1, 1], [], []>} : vector<8x24xbf16>, vector<24x128xbf16>, vector<8x128xf32> -> vector<8x128xf32>
    %25 = arith.truncf %24 : vector<8x128xf32> to vector<8x128xbf16>
    %c0_18 = arith.constant 0 : index
    %c0_19 = arith.constant 0 : index
    %26 = vector.load %arg7[%c0_18, %c0_19] : memref<128x64xbf16, #tpu.memory_space<vmem>>, vector<128x64xbf16>
    %cst_20 = arith.constant dense<0.000000e+00> : vector<8x64xf32>
    %27 = tpu.matmul %25, %26, %cst_20 {dimension_numbers = #tpu.dot_dimension_numbers<[1], [0], [0], [1], [0, 0, 1, 1], [], []>} : vector<8x128xbf16>, vector<128x64xbf16>, vector<8x64xf32> -> vector<8x64xf32>
    %c0_21 = arith.constant 0 : index
    %c0_22 = arith.constant 0 : index
    %28 = vector.load %arg8[%c0_21, %c0_22] : memref<1x64xf32, #tpu.memory_space<vmem>>, vector<1x64xf32>
    %29 = vector.broadcast %28 : vector<1x64xf32> to vector<8x64xf32>
    %30 = arith.addf %27, %29 : vector<8x64xf32>
    %31 = math.tanh %30 : vector<8x64xf32>
    %32 = arith.truncf %31 : vector<8x64xf32> to vector<8x64xbf16>
    %c0_23 = arith.constant 0 : index
    %c0_24 = arith.constant 0 : index
    %33 = vector.load %arg9[%c0_23, %c0_24] : memref<64x128xbf16, #tpu.memory_space<vmem>>, vector<64x128xbf16>
    %cst_25 = arith.constant dense<0.000000e+00> : vector<8x128xf32>
    %34 = tpu.matmul %32, %33, %cst_25 {dimension_numbers = #tpu.dot_dimension_numbers<[1], [0], [0], [1], [0, 0, 1, 1], [], []>} : vector<8x64xbf16>, vector<64x128xbf16>, vector<8x128xf32> -> vector<8x128xf32>
    %c0_26 = arith.constant 0 : index
    %c0_27 = arith.constant 0 : index
    %35 = vector.load %arg10[%c0_26, %c0_27] : memref<8x128xf32, #tpu.memory_space<vmem>>, vector<8x128xf32>
    %36 = arith.mulf %34, %35 : vector<8x128xf32>
    %c0_28 = arith.constant 0 : index
    %c0_29 = arith.constant 0 : index
    %37 = vector.load %arg11[%c0_28, %c0_29] : memref<2x8xf32, #tpu.memory_space<vmem>>, vector<2x8xf32>
    %cst_30 = arith.constant dense<0.000000e+00> : vector<2x128xf32>
    %38 = tpu.matmul %37, %36, %cst_30 {dimension_numbers = #tpu.dot_dimension_numbers<[1], [0], [0], [1], [0, 0, 1, 1], [], []>} : vector<2x8xf32>, vector<8x128xf32>, vector<2x128xf32> -> vector<2x128xf32>
    %c0_31 = arith.constant 0 : index
    %c0_32 = arith.constant 0 : index
    %39 = vector.load %arg12[%c0_31, %c0_32] : memref<128x32xf32, #tpu.memory_space<vmem>>, vector<128x32xf32>
    %cst_33 = arith.constant dense<0.000000e+00> : vector<2x32xf32>
    %40 = tpu.matmul %38, %39, %cst_33 {dimension_numbers = #tpu.dot_dimension_numbers<[1], [0], [0], [1], [0, 0, 1, 1], [], []>} : vector<2x128xf32>, vector<128x32xf32>, vector<2x32xf32> -> vector<2x32xf32>
    %c0_34 = arith.constant 0 : index
    %c0_35 = arith.constant 0 : index
    %41 = vector.load %arg13[%c0_34, %c0_35] : memref<1x32xf32, #tpu.memory_space<vmem>>, vector<1x32xf32>
    %42 = vector.broadcast %41 : vector<1x32xf32> to vector<2x32xf32>
    %43 = arith.addf %40, %42 : vector<2x32xf32>
    %44 = math.tanh %43 : vector<2x32xf32>
    %c0_36 = arith.constant 0 : index
    %c0_37 = arith.constant 0 : index
    %45 = vector.load %arg14[%c0_36, %c0_37] : memref<2x32xf32, #tpu.memory_space<vmem>>, vector<2x32xf32>
    tpu.vector_store %arg14[%c0_36, %c0_37], %44 {strides = array<i32>} : memref<2x32xf32, #tpu.memory_space<vmem>>, vector<2x32xf32>,
    return
  }
}

</mosaic_0001>

<bundles_post_ra>
// kernel: conv_mlp_encoder_forward.1
= control target key start
LH: loop header
LB: loop body
LE: loop exit
PB: predicated region body
PF: predicated region fallthrough
CT: control target
= control target key end

     0   :  { %v2076_v1 = vmov 0   ;;  %vm295_vm0 = vcmask 130048   ;;  %s2579_s0 = inlined_call_operand.vmem [shape: bf16[32,400], index: 0, kind: input, shape index: {}]   ;;  %s2580_s1 = inlined_call_operand.vmem [shape: bf16[400,128], index: 1, kind: input, shape index: {}]   ;;  %s2581_s2 = inlined_call_operand.vmem [shape: bf16[32,32], index: 2, kind: input, shape index: {}]   ;;  %s2582_s3 = inlined_call_operand.vmem [shape: bf16[128,128], index: 3, kind: input, shape index: {}]   ;;  %s2583_s4 = inlined_call_operand.vmem [shape: f32[32,128], index: 4, kind: input, shape index: {}]   ;;  %s2584_s5 = inlined_call_operand.vmem [shape: bf16[640,128], index: 5, kind: input, shape index: {}]   ;;  %s2585_s6 = inlined_call_operand.vmem [shape: bf16[8,24], index: 6, kind: input, shape index: {}]   ;;  %s2586_s7 = inlined_call_operand.vmem [shape: bf16[128,64], index: 7, kind: input, shape index: {}]   ;;  %s2587_s8 = inlined_call_operand.vmem [shape: f32[1,64], index: 8, kind: input, shape index: {}]   ;;  %s2588_s9 = inlined_call_operand.vmem [shape: bf16[64,128], index: 9, kind: input, shape index: {}]   ;;  %s2589_s10 = inlined_call_operand.vmem [shape: f32[8,128], index: 10, kind: input, shape index: {}]   ;;  %s2590_s11 = inlined_call_operand.vmem [shape: f32[2,8], index: 11, kind: input, shape index: {}]   ;;  %s2591_s12 = inlined_call_operand.vmem [shape: f32[128,32], index: 12, kind: input, shape index: {}]   ;;  %s2592_s13 = inlined_call_operand.vmem [shape: f32[1,32], index: 13, kind: input, shape index: {}]   ;;  %s2593_s14 = inlined_call_operand.hbm [shape: f32[2,32], index: 14, kind: output, shape index: {}]  }
   0x1   :  { %v1949_v0 = vld [vmem:[%s2580_s1 + $0x40] sm:$0xff]   ;;  %351 = vmatprep.subr.bf16.mxu1 %v2076_v1  ;;  %v1952_v4 = vld [vmem:[%s2580_s1 + $0x48] sm:$0xff]   ;;  %v1955_v7 = vld [vmem:[%s2580_s1 + $0x50] sm:$0xff]  }
   0x2   :  { %v1950_v2 = vld [vmem:[%s2580_s1 + $0x80] sm:$0xff]   ;;  %1648 = vmatprep.subr.bf16.mxu0 %v1949_v0  ;;  %v1953_v5 = vld [vmem:[%s2580_s1 + $0x88] sm:$0xff]   ;;  %v1956_v8 = vld [vmem:[%s2580_s1 + $0x90] sm:$0xff]  }
   0x3   :  { %v1951_v3 = vld [vmem:[%s2580_s1] sm:$0xff]   ;;  %352 = vmatpush1.bf16.msra.mxu1 %v1950_v2  ;;  %v1954_v6 = vld [vmem:[%s2580_s1 + $0x8] sm:$0xff]   ;;  %v1957_v9 = vld [vmem:[%s2580_s1 + $0x10] sm:$0xff]  }
   0x4   :  { %1649 = vmatpush3.bf16.msra.mxu0 %v1951_v3  ;;  %353 = vmatprep.subr.bf16.mxu1 %v2076_v1  ;;  %v1958_v10 = vld [vmem:[%s2580_s1 + $0x58] sm:$0xff]   ;;  %v1961_v13 = vld [vmem:[%s2580_s1 + $0x60] sm:$0xff]   ;;  %v1964_v16 = vld [vmem:[%s2580_s1 + $0x68] sm:$0xff]  }
   0x5   :  { %1650 = vmatprep.subr.bf16.mxu0 %v1952_v4  ;;  %v1959_v11 = vld [vmem:[%s2580_s1 + $0x98] sm:$0xff]   ;;  %v1962_v14 = vld [vmem:[%s2580_s1 + $0xa0] sm:$0xff]   ;;  %v1965_v17 = vld [vmem:[%s2580_s1 + $0xa8] sm:$0xff]  }
   0x6   :  { %v1960_v12 = vld [vmem:[%s2580_s1 + $0x18] sm:$0xff]   ;;  %v1963_v15 = vld [vmem:[%s2580_s1 + $0x20] sm:$0xff]   ;;  %v1966_v18 = vld [vmem:[%s2580_s1 + $0x28] sm:$0xff]  }
   0x7   :  { %354 = vmatpush1.bf16.msra.mxu1 %v1953_v5  ;;  %v1967_v19 = vld [vmem:[%s2580_s1 + $0x70] sm:$0xff]   ;;  %v1970_v22 = vld [vmem:[%s2580_s1 + $0x78] sm:$0xff]   ;;  %v1976_v28 = vld [vmem:[%s2580_s1 + $0xc0] sm:$0xff]  }
   0x8   :  { %1651 = vmatpush3.bf16.msra.mxu0 %v1954_v6  ;;  %355 = vmatprep.subr.bf16.mxu1 %v2076_v1  ;;  %v1968_v20 = vld [vmem:[%s2580_s1 + $0xb0] sm:$0xff]   ;;  %v1971_v24 = vld [vmem:[%s2580_s1 + $0xb8] sm:$0xff]  }
   0x9   :  { %1652 = vmatprep.subr.bf16.mxu0 %v1955_v7  ;;  %v1969_v21 = vld [vmem:[%s2580_s1 + $0x30] sm:$0xff]   ;;  %v1979_v25 = vld [vmem:[%s2579_s0 + $0xc] ss:$16 sps:$4 sm:$0xff]   ;;  %v1977_v30 = vld [vmem:[%s2579_s0 + $0x8] ss:$16 sps:$4 sm:$0xff]  }
   0xa   :  { %v1975_v23 = vld [vmem:[%s2579_s0 + $0x4] ss:$16 sps:$4 sm:$0xff]   ;;  %v1972_v26 = vld [vmem:[%s2580_s1 + $0x38] sm:$0xff]   ;;  %v1973_v27 = vld [vmem:[%s2579_s0] ss:$16 sps:$4 sm:$0xff]   ;;  %1577 = vmatprep.mubr.msk.bf16.mxu1 %vm295_vm0, %v1979_v25 }
   0xb   :  { %356 = vmatpush1.bf16.msra.mxu1 %v1956_v8  ;;  %334 = vmatprep.mubr.bf16.mxu0 %v1975_v23  ;;  %v1980_v29 = vld [vmem:[%s2579_s0 + $0x24] ss:$16 sps:$4 sm:$0xff]   ;;  %v1983_v31 = vld [vmem:[%s2579_s0 + $0x2c] ss:$16 sps:$4 sm:$0xff]   ;;  %v1982_v32 = vld [vmem:[%s2579_s0 + $0x20] ss:$16 sps:$4 sm:$0xff]  }
   0xc   :  { %1653 = vmatpush3.bf16.msra.mxu0 %v1957_v9  ;;  %357 = vmatprep.subr.bf16.mxu1 %v2076_v1  ;;  %v1985_v33 = vld [vmem:[%s2579_s0 + $0x28] ss:$16 sps:$4 sm:$0xff]  }
   0xd   :  { %1654 = vmatprep.subr.bf16.mxu0 %v1958_v10 }
   0xf   :  { %358 = vmatpush1.bf16.msra.mxu1 %v1959_v11 }
  0x10   :  { %1655 = vmatpush3.bf16.msra.mxu0 %v1960_v12  ;;  %359 = vmatprep.subr.bf16.mxu1 %v2076_v1 }
  0x11   :  { %1656 = vmatprep.subr.bf16.mxu0 %v1961_v13 }
  0x13   :  { %360 = vmatpush1.bf16.msra.mxu1 %v1962_v14 }
  0x14   :  { %1657 = vmatpush3.bf16.msra.mxu0 %v1963_v15  ;;  %361 = vmatprep.subr.bf16.mxu1 %v2076_v1 }
  0x15   :  { %1658 = vmatprep.subr.bf16.mxu0 %v1964_v16 }
  0x17   :  { %362 = vmatpush1.bf16.msra.mxu1 %v1965_v17 }
  0x18   :  { %1659 = vmatpush3.bf16.msra.mxu0 %v1966_v18  ;;  %363 = vmatprep.subr.bf16.mxu1 %v2076_v1 }
  0x19   :  { %1660 = vmatprep.subr.bf16.mxu0 %v1967_v19 }
  0x1b   :  { %364 = vmatpush1.bf16.msra.mxu1 %v1968_v20 }
  0x1c   :  { %1661 = vmatpush3.bf16.msra.mxu0 %v1969_v21  ;;  %365 = vmatprep.subr.bf16.mxu1 %v2076_v1 }
  0x1d   :  { %1662 = vmatprep.subr.bf16.mxu0 %v1970_v22 }
  0x1f   :  { %366 = vmatpush1.bf16.msra.mxu1 %v1971_v24 }
  0x20   :  { %1663 = vmatpush3.bf16.msra.mxu0 %v1972_v26  ;;  %367 = vmatprep.subr.bf16.mxu1 %v2076_v1 }
  0x23   :  { %335 = vmatmul.mubr.bf16.vlgmr.msra.gmra.mrb[0].mxu0 %v1973_v27  ;;  %368 = vmatpush1.bf16.msra.mxu1 %v1976_v28 }
  0x24   :  { %342 = vmatprep.mubr.bf16.mxu0 %v1980_v29 }
  0x26   :  { %384 = vmatmul.mubr.bf16.vlgmr.msra.gmra.mrb[0].mxu1 %v1977_v30 }
  0x27   :  { %1578 = vmatprep.mubr.msk.bf16.mxu1 %vm295_vm0, %v1983_v31 }
  0x2b   :  { %343 = vmatmul.mubr.bf16.gmra.mrb[4].mxu0 %v1982_v32 }
  0x2e   :  { %392 = vmatmul.mubr.bf16.gmra.mrb[4].mxu1 %v1985_v33 }
  0x2f   :  { %19 = vsyncpa [#allocation3], 0  ;;  %v1986_v34 = vld [vmem:[%s2581_s2] sm:$0xff]   ;;  %vm416_vm1 = vcmask 261120   ;;  %v1989_v36 = vld [vmem:[%s2582_s3 + $0x8] sm:$0xff]   ;;  %vm599_vm2 = vcmask 1046528  }
  0x30   :  { %1796 = vmatprep.mubr.msk.bf16.mxu0 %vm416_vm1, %v1986_v34  ;;  %v1988_v35 = vld [vmem:[%s2582_s3] sm:$0xff]   ;;  %v1990_v37 = vld [vmem:[%s2582_s3 + $0x10] sm:$0xff]   ;;  %v1991_v38 = vld [vmem:[%s2582_s3 + $0x18] sm:$0xff]   ;;  %vm621_vm3 = vcmask 1044480   ;;  %vm610_vm4 = vcmask 1045504   ;;  %vm632_vm5 = vcmask 1043456  }
  0x31   :  { %1800 = vmatprep.subr.bf16.mxu1 %v1988_v35  ;;  %v1992_v39 = vld [vmem:[%s2582_s3 + $0x20] sm:$0xff]   ;;  %v1993_v40 = vld [vmem:[%s2582_s3 + $0x28] sm:$0xff]   ;;  %v1994_v41 = vld [vmem:[%s2582_s3 + $0x30] sm:$0xff]   ;;  %vm2078_vm6 = vmmov 0   ;;  %vm1120_vm7 = vcmask 195584   ;;  %vm1313_vm8 = vcmask 523264  }
  0x32   :  { %1801 = vmatpush3.bf16.msra.mxu1 %v1988_v35  ;;  %v1987_v4 = vld [vmem:[%s2581_s2 + $0x8] sm:$0xff]   ;;  %v1995_v5 = vld [vmem:[%s2582_s3 + $0x38] sm:$0xff]   ;;  %v1996_v6 = vld [vmem:[%s2584_s5 + $0x40] sm:$0xff]   ;;  %vm1360_vm9 = vcmask 64512   ;;  %s2080_s27 = smov [#allocation2]   ;;  %vm1528_vm10 = vcmask 254976  }
  0x33   :  { %1802 = vmatprep.subr.bf16.mxu1 %v1989_v36  ;;  %v1997_v7 = vld [vmem:[%s2584_s5] sm:$0xff]   ;;  %v2000_v9 = vld [vmem:[%s2584_s5 + $0x48] sm:$0xff]   ;;  %v2004_v11 = vld [vmem:[%s2584_s5 + $0x50] sm:$0xff]   ;;  %s1536_s28 = sshll.u32 %s2080_s27, 4  ;;  %s1537_s28 = int_to_ptr.vmem [resolvable:$true] %s1536_s28 }
  0x34   :  { %v1998_v8 = vld [vmem:[%s2584_s5 + $0xc0] sm:$0xff]   ;;  %v2001_v10 = vld [vmem:[%s2584_s5 + $0x8] sm:$0xff]   ;;  %v2005_v12 = vld [vmem:[%s2584_s5 + $0x10] sm:$0xff]   ;;  %p2057_p1 = scmp.lt.s32.totalorder %s1537_s28, %s1537_s28 }
  0x35   :  { %v2008_v13 = vld [vmem:[%s2584_s5 + $0x58] sm:$0xff]   ;;  %v2012_v15 = vld [vmem:[%s2584_s5 + $0x60] sm:$0xff]   ;;  %v2002_v24 = vld [vmem:[%s2584_s5 + $0xc8] sm:$0xff]  }
  0x36   :  { %1803 = vmatpush3.bf16.msra.mxu1 %v1989_v36  ;;  %v2009_v14 = vld [vmem:[%s2584_s5 + $0x18] sm:$0xff]   ;;  %v2013_v16 = vld [vmem:[%s2584_s5 + $0x20] sm:$0xff]   ;;  %v2003_v25 = vld [vmem:[%s2584_s5 + $0x88] sm:$0xff]  }
  0x37   :  { %1804 = vmatprep.subr.bf16.mxu1 %v1990_v37  ;;  %v1999_v23 = vld [vmem:[%s2584_s5 + $0x80] sm:$0xff]   ;;  %v2006_v26 = vld [vmem:[%s2584_s5 + $0xd0] sm:$0xff]   ;;  %v2010_v28 = vld [vmem:[%s2584_s5 + $0xd8] sm:$0xff]  }
  0x38   :  { %v2007_v27 = vld [vmem:[%s2584_s5 + $0x90] sm:$0xff]   ;;  %v2011_v29 = vld [vmem:[%s2584_s5 + $0x98] sm:$0xff]   ;;  %v2014_v30 = vld [vmem:[%s2584_s5 + $0xe0] sm:$0xff]  }
  0x39   :  { %v2015_v31 = vld [vmem:[%s2584_s5 + $0xa0] sm:$0xff]   ;;  %v2016_v32 = vld [vmem:[%s2584_s5 + $0x68] sm:$0xff]   ;;  %v2020_v36 = vld [vmem:[%s2584_s5 + $0x70] sm:$0xff]  }
  0x3a   :  { %1805 = vmatpush3.bf16.msra.mxu1 %v1990_v37  ;;  %v2017_v33 = vld [vmem:[%s2584_s5 + $0x28] sm:$0xff]   ;;  %v2021_v37 = vld [vmem:[%s2584_s5 + $0x30] sm:$0xff]  }
  0x3b   :  { %1806 = vmatprep.subr.bf16.mxu1 %v1991_v38  ;;  %v2018_v34 = vld [vmem:[%s2584_s5 + $0xe8] sm:$0xff]  }
  0x3c   :  { %v2019_v35 = vld [vmem:[%s2584_s5 + $0xa8] sm:$0xff]  }
  0x3e   :  { %1807 = vmatpush3.bf16.msra.mxu1 %v1991_v38  ;;  %v2022_v38 = vld [vmem:[%s2584_s5 + $0xf0] sm:$0xff]  }
  0x3f   :  { %1808 = vmatprep.subr.bf16.mxu1 %v1992_v39 }
  0x42   :  { %1809 = vmatpush3.bf16.msra.mxu1 %v1992_v39  ;;  %v2023_v39 = vld [vmem:[%s2584_s5 + $0xb0] sm:$0xff]  }
  0x43   :  { %1810 = vmatprep.subr.bf16.mxu1 %v1993_v40 }
  0x46   :  { %1811 = vmatpush3.bf16.msra.mxu1 %v1993_v40  ;;  %v2024_v40 = vld [vmem:[%s2584_s5 + $0x78] sm:$0xff]  }
  0x47   :  { %1812 = vmatprep.subr.bf16.mxu1 %v1994_v41 }
  0x4a   :  { %1813 = vmatpush3.bf16.msra.mxu1 %v1994_v41  ;;  %v2025_v41 = vld [vmem:[%s2584_s5 + $0x38] sm:$0xff]  }
  0x4b   :  { %1814 = vmatprep.subr.bf16.mxu1 %v1995_v5 }
  0x4e   :  { %1815 = vmatpush3.bf16.msra.mxu1 %v1995_v5 }
  0x4f   :  { %1718 = vmatprep.subr.bf16.mxu1 %v1998_v8 }
  0xf6   :  { %v1664_v42 = vpop.f32.mrb[0].mxu0 }
  0xf7   :  { %v1665_v43 = vpop.f32.mrb[1].mxu0 }
  0xf8   :  { %v1666_v44 = vadd.f32 %v1665_v43, %v1664_v42  ;;  %v1667_v45 = vpop.f32.mrb[2].mxu0  ;;  %v2026_v42 = vld [vmem:[%s2584_s5 + $0xf8] sm:$0xff]  }
  0xf9   :  { %v1668_v46 = vpop.f32.mrb[3].mxu0  ;;  %v385_v47 = vpop.f32.mrb[0].mxu1  ;;  %v2027_v43 = vld [vmem:[%s2584_s5 + $0xb8] sm:$0xff]  }
  0xfa   :  { %v1669_v48 = vadd.f32 %v1668_v46, %v1667_v45  ;;  %v386_v49 = vadd.f32 %v1666_v44, %v385_v47  ;;  %v387_v50 = vpop.f32.mrb[1].mxu1  ;;  %v2028_v44 = vld [vmem:[%s2584_s5 + $0x100] sm:$0xff]   ;;  %v492_v45 = vld [vmem:[%s2583_s4 + $0x10] sm:$0xff] }
  0xfb   :  { %v388_v51 = vpop.f32.mrb[2].mxu1  ;;  %v490_v46 = vld [vmem:[%s2583_s4] sm:$0xff] }
  0xfc   :  { %v389_v52 = vadd.f32 %v1669_v48, %v388_v51  ;;  %v390_v53 = vpop.f32.mrb[3].mxu1  ;;  %v493_v48 = vld [vmem:[%s2583_s4 + $0x18] sm:$0xff]  ;;  %v491_v51 = vld [vmem:[%s2583_s4 + $0x8] sm:$0xff] }
  0xfe   :  { %v404_v54 = vpack.c.bf16 %v389_v52, %v386_v49  ;;  %v1670_v55 = vpop.f32.mrb[4].mxu0 }
  0xff   :  { %v1671_v56 = vpop.f32.mrb[5].mxu0 }
 0x100   :  { %v1672_v57 = vadd.f32 %v1671_v56, %v1670_v55  ;;  %v1673_v58 = vpop.f32.mrb[6].mxu0  ;;  %1792 = vmatprep.subr.bf16.mxu0 %v404_v54 }
 0x101   :  { %v1674_v59 = vpop.f32.mrb[7].mxu0  ;;  %v393_v60 = vpop.f32.mrb[4].mxu1  ;;  %1793 = vmatpush3.bf16.msra.mxu0 %v404_v54 }
 0x102   :  { %v1675_v61 = vadd.f32 %v1674_v59, %v1673_v58  ;;  %v394_v62 = vadd.f32 %v1672_v57, %v393_v60  ;;  %v395_v63 = vpop.f32.mrb[5].mxu1 }
 0x103   :  { %v396_v0 = vpop.f32.mrb[6].mxu1 }
 0x104   :  { %v397_v1 = vadd.f32 %v1675_v61, %v396_v0  ;;  %v398_v2 = vpop.f32.mrb[7].mxu1 }
 0x106   :  { %v405_v3 = vpack.c.bf16 %v397_v1, %v394_v62 }
 0x108   :  { %1794 = vmatprep.subr.bf16.mxu0 %v405_v3 }
 0x109   :  { %1795 = vmatpush3.bf16.msra.mxu0 %v405_v3 }
 0x10a   :  { %1690 = vmatprep.subr.bf16.mxu0 %v1996_v6 }
 0x10c   :  { %1797 = vmatmul.mubr.msk.bf16.vlgmr.msra.gmra.mrb[8].mxu0 %vm416_vm1, %v1987_v4 }
 0x10d   :  { %1691 = vmatpush3.bf16.msra.mxu0 %v1997_v7 }
 0x10e   :  { %1692 = vmatprep.subr.bf16.mxu0 %v2000_v9 }
 0x111   :  { %1693 = vmatpush3.bf16.msra.mxu0 %v2001_v10 }
 0x112   :  { %1694 = vmatprep.subr.bf16.mxu0 %v2004_v11 }
 0x115   :  { %1695 = vmatpush3.bf16.msra.mxu0 %v2005_v12 }
 0x116   :  { %1696 = vmatprep.subr.bf16.mxu0 %v2008_v13 }
 0x119   :  { %1697 = vmatpush3.bf16.msra.mxu0 %v2009_v14 }
 0x11a   :  { %1698 = vmatprep.subr.bf16.mxu0 %v2012_v15 }
 0x11d   :  { %1699 = vmatpush3.bf16.msra.mxu0 %v2013_v16 }
 0x11e   :  { %1700 = vmatprep.subr.bf16.mxu0 %v2016_v32  ;;  %v2030_v32 = vld [vmem:[%s2584_s5 + $0x110] sm:$0xff]  }
 0x121   :  { %1701 = vmatpush3.bf16.msra.mxu0 %v2017_v33 }
 0x122   :  { %1702 = vmatprep.subr.bf16.mxu0 %v2020_v36  ;;  %v2031_v36 = vld [vmem:[%s2584_s5 + $0x118] sm:$0xff]  }
 0x125   :  { %1703 = vmatpush3.bf16.msra.mxu0 %v2021_v37  ;;  %v2032_v37 = vld [vmem:[%s2584_s5 + $0x120] sm:$0xff]  }
 0x126   :  { %1704 = vmatprep.subr.bf16.mxu0 %v2024_v40  ;;  %v2035_v40 = vld [vmem:[%s2584_s5 + $0x138] sm:$0xff]  }
 0x129   :  { %1705 = vmatpush3.bf16.msra.mxu0 %v2025_v41 }
 0x12a   :  { %1820 = vmatprep.subr.bf16.mxu0 %v2028_v44 }
 0x1df   :  { %v1798_v17 = vpop.f32.mrb[8].mxu0 }
 0x1e0   :  { %v457_v18 = vpop.f32.mrb[9].mxu0 }
 0x1e1   :  { %v1799_v19 = vpop.f32.mrb[10].mxu0 }
 0x1e2   :  { %v473_v20 = vpack.c.bf16 %v1799_v19, %v1798_v17  ;;  %v460_v21 = vpop.f32.mrb[11].mxu0 }
 0x1e3   :  { %v472_v22 = vpack.c.bf16 %v460_v21, %v457_v18 }
 0x1e5   :  { %1816 = vmatprep.mubr.bf16.mxu1 %v472_v22  ;;  %v2029_v22 = vld [vmem:[%s2584_s5 + $0x108] sm:$0xff]  }
 0x1e6   :  { %1817 = vmatmul.mubr.bf16.vlgmr.msra.gmra.mrb[8].mxu1 %v473_v20 }
 0x1e7   :  { %1719 = vmatpush3.bf16.msra.mxu1 %v1999_v23 }
 0x1e8   :  { %1720 = vmatprep.subr.bf16.mxu1 %v2002_v24 }
 0x1eb   :  { %1721 = vmatpush3.bf16.msra.mxu1 %v2003_v25 }
 0x1ec   :  { %1722 = vmatprep.subr.bf16.mxu1 %v2006_v26 }
 0x1ef   :  { %1723 = vmatpush3.bf16.msra.mxu1 %v2007_v27 }
 0x1f0   :  { %1724 = vmatprep.subr.bf16.mxu1 %v2010_v28 }
 0x1f3   :  { %1725 = vmatpush3.bf16.msra.mxu1 %v2011_v29 }
 0x1f4   :  { %1726 = vmatprep.subr.bf16.mxu1 %v2014_v30 }
 0x1f7   :  { %1727 = vmatpush3.bf16.msra.mxu1 %v2015_v31 }
 0x1f8   :  { %1728 = vmatprep.subr.bf16.mxu1 %v2018_v34 }
 0x1fb   :  { %1729 = vmatpush3.bf16.msra.mxu1 %v2019_v35 }
 0x1fc   :  { %1730 = vmatprep.subr.bf16.mxu1 %v2022_v38  ;;  %v2033_v38 = vld [vmem:[%s2584_s5 + $0x128] sm:$0xff]  }
 0x1ff   :  { %1731 = vmatpush3.bf16.msra.mxu1 %v2023_v39  ;;  %v2034_v39 = vld [vmem:[%s2584_s5 + $0x130] sm:$0xff]  }
 0x200   :  { %1732 = vmatprep.subr.bf16.mxu1 %v2026_v42  ;;  %v2077_v42 = vmov 0.0  }
 0x203   :  { %1733 = vmatpush3.bf16.msra.mxu1 %v2027_v43 }
 0x204   :  { %1868 = vmatprep.subr.bf16.mxu1 %v2077_v42 }
 0x2b9   :  { %v1818_v47 = vpop.f32.mrb[8].mxu1 }
 0x2ba   :  { %v585_v49 = vadd.f32 %v1818_v47, %v492_v45  ;;  %v576_v50 = vpop.f32.mrb[9].mxu1 }
 0x2bb   :  { %v577_v52 = vadd.f32 %v576_v50, %v490_v46  ;;  %v1819_v53 = vpop.f32.mrb[10].mxu1 }
 0x2bc   :  { %v593_v54 = vmax.f32 %v585_v49, 0.0  ;;  %v588_v55 = vadd.f32 %v1819_v53, %v493_v48  ;;  %v579_v56 = vpop.f32.mrb[11].mxu1 }
 0x2bd   :  { %v591_v57 = vmax.f32 %v577_v52, 0.0  ;;  %v580_v58 = vadd.f32 %v579_v56, %v491_v51 }
 0x2be   :  { %v594_v59 = vmax.f32 %v588_v55, 0.0  ;;  %v603_v60 = vrot.slane %v593_v54, 1  ;;  %v625_v63 = vrot.slane %v593_v54, 3  ;;  %v614_v0 = vrot.slane %v593_v54, 2 }
 0x2bf   :  { %v592_v61 = vmax.f32 %v580_v58, 0.0  ;;  %v600_v62 = vrot.slane %v591_v57, 1  ;;  %v622_v1 = vrot.slane %v591_v57, 3  ;;  %v611_v2 = vrot.slane %v591_v57, 2 }
 0x2c0   :  { %v605_v3 = vrot.slane %v594_v59, 1  ;;  %v627_v4 = vrot.slane %v594_v59, 3  ;;  %v638_v9 = vrot.slane %v594_v59, 4  ;;  %v616_v12 = vrot.slane %v594_v59, 2 }
 0x2c1   :  { %v601_v5 = vrot.slane %v592_v61, 1  ;;  %v623_v6 = vrot.slane %v592_v61, 3  ;;  %v643_v7 = vpack.c.bf16 %v592_v61, %v591_v57  ;;  %v612_v8 = vrot.slane %v592_v61, 2 }
 0x2c2   :  { %v606_v10 = vsel %vm599_vm2, %v603_v60, %v605_v3  ;;  %v628_v11 = vsel %vm621_vm3, %v625_v63, %v627_v4  ;;  %v617_v23 = vsel %vm610_vm4, %v614_v0, %v616_v12  ;;  %v633_v25 = vrot.slane %v591_v57, 4 }
 0x2c3   :  { %v602_v13 = vsel %vm599_vm2, %v600_v62, %v601_v5  ;;  %v604_v14 = vsel %vm599_vm2, %v601_v5, %v603_v60  ;;  %v624_v15 = vsel %vm621_vm3, %v622_v1, %v623_v6  ;;  %v626_v16 = vsel %vm621_vm3, %v623_v6, %v625_v63 }
 0x2c4   :  { %v644_v17 = vpack.c.bf16 %v604_v14, %v602_v13  ;;  %v646_v18 = vpack.c.bf16 %v626_v16, %v624_v15  ;;  %v613_v19 = vsel %vm610_vm4, %v611_v2, %v612_v8  ;;  %v615_v20 = vsel %vm610_vm4, %v612_v8, %v614_v0  ;;  %v1117_v14 = vld [vmem:[%s2585_s6] sm:$0xf]  ;;  %v2037_v16 = vld [vmem:[%s2586_s7 + $0x8] sm:$0xff]  }
 0x2c5   :  { %v645_v21 = vpack.c.bf16 %v615_v20, %v613_v19  ;;  %v649_v24 = vpack.c.bf16 %v606_v10, %v606_v10  ;;  %v634_v26 = vrot.slane %v592_v61, 4  ;;  %v636_v27 = vrot.slane %v593_v54, 4  ;;  %v2036_v15 = vld [vmem:[%s2586_s7] sm:$0xff]   ;;  %v2041_v20 = vld [vmem:[%s2586_s7 + $0x28] sm:$0xff]  }
 0x2c6   :  { %1005 = vmatprep.mubr.bf16.mxu0 %v644_v17  ;;  %1053 = vmatprep.mubr.bf16.mxu1 %v646_v18  ;;  %v651_v28 = vpack.c.bf16 %v628_v11, %v628_v11  ;;  %v648_v34 = vpack.c.bf16 %v593_v54, %v593_v54  ;;  %v650_v35 = vpack.c.bf16 %v617_v23, %v617_v23  ;;  %v2038_v17 = vld [vmem:[%s2586_s7 + $0x10] sm:$0xff]   ;;  %v2039_v18 = vld [vmem:[%s2586_s7 + $0x18] sm:$0xff]   ;;  %v2040_v19 = vld [vmem:[%s2586_s7 + $0x20] sm:$0xff]  }
 0x2c7   :  { %1006 = vmatmul.mubr.bf16.vlgmr.msra.gmra.mrb[12].mxu0 %v643_v7  ;;  %1054 = vmatmul.mubr.bf16.vlgmr.msra.gmra.mrb[12].mxu1 %v645_v21  ;;  %v635_v29 = vsel %vm632_vm5, %v633_v25, %v634_v26  ;;  %v637_v30 = vsel %vm632_vm5, %v634_v26, %v636_v27  ;;  %v639_v31 = vsel %vm632_vm5, %v636_v27, %v638_v9  ;;  %v2042_v21 = vld [vmem:[%s2586_s7 + $0x30] sm:$0xff]  }
 0x2c8   :  { %1821 = vmatpush3.bf16.msra.mxu0 %v2028_v44  ;;  %1013 = vmatprep.mubr.bf16.mxu0 %v649_v24  ;;  %v647_v33 = vpack.c.bf16 %v637_v30, %v635_v29  ;;  %v652_v41 = vpack.c.bf16 %v639_v31, %v639_v31  ;;  %v2045_v29 = vld [vmem:[%s2588_s9 + $0x8] sm:$0xff]   ;;  %v2046_v30 = vld [vmem:[%s2588_s9 + $0x10] sm:$0xff]   ;;  %v2047_v31 = vld [vmem:[%s2588_s9 + $0x18] sm:$0xff]  }
 0x2c9   :  { %1061 = vmatprep.mubr.bf16.mxu1 %v651_v28  ;;  %1822 = vmatprep.subr.bf16.mxu0 %v2029_v22  ;;  %v2044_v28 = vld [vmem:[%s2588_s9] sm:$0xff]  }
 0x2ca   :  { %1869 = vmatpush3.bf16.msra.mxu1 %v2044_v28 }
 0x2cb   :  { %1870 = vmatprep.subr.bf16.mxu1 %v2077_v42 }
 0x2cc   :  { %1823 = vmatpush3.bf16.msra.mxu0 %v2029_v22  ;;  %v2043_v22 = vld [vmem:[%s2586_s7 + $0x38] sm:$0xff]  }
 0x2cd   :  { %1824 = vmatprep.subr.bf16.mxu0 %v2030_v32 }
 0x2ce   :  { %1871 = vmatpush3.bf16.msra.mxu1 %v2045_v29 }
 0x2cf   :  { %1014 = vmatmul.mubr.bf16.gmra.mrb[16].mxu0 %v648_v34  ;;  %1062 = vmatmul.mubr.bf16.gmra.mrb[16].mxu1 %v650_v35 }
 0x2d0   :  { %1825 = vmatpush3.bf16.msra.mxu0 %v2030_v32  ;;  %1836 = vmatprep.mubr.bf16.mxu0 %v647_v33  ;;  %v1632_v32 = vld [vmem:[%s2587_s8] ss:$0 sm:$0xff] }
 0x2d1   :  { %1826 = vmatprep.subr.bf16.mxu0 %v2031_v36  ;;  %1876 = vmatprep.mubr.msk.bf16.mxu1 %vm2078_vm6, %v2077_v42 }
 0x2d2   :  { %1872 = vmatprep.subr.bf16.mxu1 %v2077_v42 }
 0x2d3   :  { %1873 = vmatpush3.bf16.msra.mxu1 %v2046_v30 }
 0x2d4   :  { %1827 = vmatpush3.bf16.msra.mxu0 %v2031_v36  ;;  %1874 = vmatprep.subr.bf16.mxu1 %v2077_v42 }
 0x2d5   :  { %1828 = vmatprep.subr.bf16.mxu0 %v2032_v37 }
 0x2d7   :  { %1875 = vmatpush3.bf16.msra.mxu1 %v2047_v31 }
 0x2d8   :  { %1829 = vmatpush3.bf16.msra.mxu0 %v2032_v37  ;;  %1880 = vmatprep.subr.mxu1 %v2077_v42 }
 0x2d9   :  { %1830 = vmatprep.subr.bf16.mxu0 %v2033_v38 }
 0x2dc   :  { %1831 = vmatpush3.bf16.msra.mxu0 %v2033_v38 }
 0x2dd   :  { %1832 = vmatprep.subr.bf16.mxu0 %v2034_v39 }
 0x2e0   :  { %1833 = vmatpush3.bf16.msra.mxu0 %v2034_v39 }
 0x2e1   :  { %1834 = vmatprep.subr.bf16.mxu0 %v2035_v40 }
 0x2e4   :  { %1835 = vmatpush3.bf16.msra.mxu0 %v2035_v40  ;;  %v1357_v40 = vld [vmem:[%s2589_s10] sm:$0xff] }
 0x2e5   :  { %1840 = vmatprep.subr.bf16.mxu0 %v2077_v42 }
 0x2e7   :  { %1837 = vmatmul.mubr.bf16.vlgmr.msra.gmra.mrb[20].mxu0 %v652_v41  ;;  %v1434_v41 = vld [vmem:[%s2591_s12] sm:$0xff] }
 0x2e8   :  { %1844 = vmatprep.mubr.msk.bf16.mxu0 %vm2078_vm6, %v2077_v42 }
 0x39a   :  { %v1706_v43 = vpop.f32.mrb[12].mxu0  ;;  %v1734_v44 = vpop.f32.mrb[12].mxu1 }
 0x39b   :  { %v1707_v45 = vpop.f32.mrb[13].mxu0  ;;  %v1735_v46 = vpop.f32.mrb[13].mxu1 }
 0x39c   :  { %v1708_v47 = vadd.f32 %v1707_v45, %v1706_v43  ;;  %v1736_v48 = vadd.f32 %v1735_v46, %v1734_v44  ;;  %v1709_v49 = vpop.f32.mrb[14].mxu0  ;;  %v1737_v50 = vpop.f32.mrb[14].mxu1  ;;  %v1435_v43 = vld [vmem:[%s2591_s12 + $0x8] sm:$0xff] }
 0x39d   :  { %v1710_v51 = vpop.f32.mrb[15].mxu0  ;;  %v1738_v52 = vpop.f32.mrb[15].mxu1 }
 0x39e   :  { %v1711_v53 = vadd.f32 %v1710_v51, %v1709_v49  ;;  %v1739_v54 = vadd.f32 %v1738_v52, %v1737_v50  ;;  %v1056_v55 = vadd.f32 %v1736_v48, %v1708_v47  ;;  %v1359_v47 = vld [vmem:[%s2590_s11] sm:$0x3]  ;;  %v1921_v48 = vpack.c.bf16 %v1435_v43, %v1434_v41  ;;  %v1436_v50 = vld [vmem:[%s2591_s12 + $0x10] sm:$0xff]  ;;  %v1437_v51 = vld [vmem:[%s2591_s12 + $0x18] sm:$0xff] }
 0x3a0   :  { %v1059_v56 = vadd.f32 %v1739_v54, %v1711_v53  ;;  %v2079_v53 = vmov 0.0|0.0   ;;  %v1924_v54 = vpack.c.bf16 %v1437_v51, %v1436_v50 }
 0x3a2   :  { %v1712_v57 = vpop.f32.mrb[16].mxu0  ;;  %v1740_v58 = vpop.f32.mrb[16].mxu1 }
 0x3a3   :  { %v1713_v59 = vpop.f32.mrb[17].mxu0  ;;  %v1741_v60 = vpop.f32.mrb[17].mxu1 }
 0x3a4   :  { %v1714_v61 = vadd.f32 %v1713_v59, %v1712_v57  ;;  %v1742_v62 = vadd.f32 %v1741_v60, %v1740_v58  ;;  %v1715_v63 = vpop.f32.mrb[18].mxu0  ;;  %v1743_v0 = vpop.f32.mrb[18].mxu1  ;;  %v1440_v58 = vld [vmem:[%s2591_s12 + $0x30] sm:$0xff]  ;;  %v1442_v60 = vld [vmem:[%s2591_s12 + $0x40] sm:$0xff] }
 0x3a5   :  { %v1716_v1 = vpop.f32.mrb[19].mxu0  ;;  %v1744_v2 = vpop.f32.mrb[19].mxu1  ;;  %v1444_v63 = vld [vmem:[%s2591_s12 + $0x50] sm:$0xff]  ;;  %v1445_v0 = vld [vmem:[%s2591_s12 + $0x58] sm:$0xff] }
 0x3a6   :  { %v1064_v3 = vadd.f32 %v1742_v62, %v1714_v61  ;;  %v1443_v61 = vld [vmem:[%s2591_s12 + $0x48] sm:$0xff]  ;;  %v1936_v1 = vpack.c.bf16 %v1445_v0, %v1444_v63  ;;  %v1446_v2 = vld [vmem:[%s2591_s12 + $0x60] sm:$0xff] }
 0x3a7   :  { %v1933_v62 = vpack.c.bf16 %v1443_v61, %v1442_v60 }
 0x3ba   :  { %v1838_v4 = vpop.f32.mrb[20].mxu0 }
 0x3bb   :  { %v1112_v5 = vadd.f32 %v1838_v4, %v1064_v3  ;;  %v1103_v6 = vpop.f32.mrb[21].mxu0  ;;  %v1447_v3 = vld [vmem:[%s2591_s12 + $0x68] sm:$0xff] }
 0x3bc   :  { %v1104_v7 = vadd.f32 %v1103_v6, %v1056_v55  ;;  %v1839_v8 = vpop.f32.mrb[22].mxu0  ;;  %v1438_v55 = vld [vmem:[%s2591_s12 + $0x20] sm:$0xff]  ;;  %v1939_v4 = vpack.c.bf16 %v1447_v3, %v1446_v2  ;;  %v1449_v6 = vld [vmem:[%s2591_s12 + $0x78] sm:$0xff] }
 0x3bd   :  { %v1106_v9 = vpop.f32.mrb[23].mxu0  ;;  %v1119_v12 = vpack.c.bf16 %v1112_v5, %v1112_v5  ;;  %v1448_v5 = vld [vmem:[%s2591_s12 + $0x70] sm:$0xff] }
 0x3be   :  { %v1107_v10 = vadd.f32 %v1106_v9, %v1059_v56  ;;  %v1439_v56 = vld [vmem:[%s2591_s12 + $0x28] sm:$0xff] }
 0x3bf   :  { %v1125_v13 = vsel %vm632_vm5, %v1119_v12, 0  ;;  %v1927_v57 = vpack.c.bf16 %v1439_v56, %v1438_v55 }
 0x3c0   :  { %v1118_v11 = vpack.c.bf16 %v1107_v10, %v1104_v7  ;;  %v1942_v7 = vpack.c.bf16 %v1449_v6, %v1448_v5  ;;  %v1647_v10 = vld [vmem:[%s2592_s13] ss:$0 sm:$0xff] }
 0x3c2   :  { %1841 = vmatpush3.bf16.msra.mxu0 %v1118_v11 }
 0x3c3   :  { %1842 = vmatprep.subr.bf16.mxu0 %v2077_v42 }
 0x3c6   :  { %1843 = vmatpush3.bf16.msra.mxu0 %v1125_v13 }
 0x3c7   :  { %1848 = vmatprep.subr.bf16.mxu0 %v2077_v42 }
 0x3c9   :  { %1845 = vmatmul.mubr.msk.bf16.vlgmr.msra.gmra.mrb[24].mxu0 %vm1120_vm7, %v1117_v14 }
 0x3ca   :  { %1849 = vmatpush3.bf16.msra.mxu0 %v2036_v15  ;;  %1864 = vmatprep.mubr.msk.bf16.mxu0 %vm2078_vm6, %v2077_v42 }
 0x3cb   :  { %1850 = vmatprep.subr.bf16.mxu0 %v2077_v42 }
 0x3ce   :  { %1851 = vmatpush3.bf16.msra.mxu0 %v2037_v16 }
 0x3cf   :  { %1852 = vmatprep.subr.bf16.mxu0 %v2077_v42 }
 0x3d2   :  { %1853 = vmatpush3.bf16.msra.mxu0 %v2038_v17 }
 0x3d3   :  { %1854 = vmatprep.subr.bf16.mxu0 %v2077_v42 }
 0x3d6   :  { %1855 = vmatpush3.bf16.msra.mxu0 %v2039_v18 }
 0x3d7   :  { %1856 = vmatprep.subr.bf16.mxu0 %v2077_v42 }
 0x3da   :  { %1857 = vmatpush3.bf16.msra.mxu0 %v2040_v19 }
 0x3db   :  { %1858 = vmatprep.subr.bf16.mxu0 %v2077_v42 }
 0x3de   :  { %1859 = vmatpush3.bf16.msra.mxu0 %v2041_v20 }
 0x3df   :  { %1860 = vmatprep.subr.bf16.mxu0 %v2077_v42 }
 0x3e2   :  { %1861 = vmatpush3.bf16.msra.mxu0 %v2042_v21 }
 0x3e3   :  { %1862 = vmatprep.subr.bf16.mxu0 %v2077_v42 }
 0x3e6   :  { %1863 = vmatpush3.bf16.msra.mxu0 %v2043_v22 }
 0x49c   :  { %v1161_v23 = vpop.f32.mrb[24].mxu0 }
 0x49d   :  { %v1167_v24 = vpack.c.bf16 %v1161_v23, %v1161_v23  ;;  %v1846_v25 = vpop.f32.mrb[25].mxu0 }
 0x49e   :  { %v1164_v26 = vpop.f32.mrb[26].mxu0 }
 0x49f   :  { %v1847_v27 = vpop.f32.mrb[27].mxu0  ;;  %1865 = vmatmul.mubr.bf16.vlgmr.msra.gmra.mrb[28].mxu0 %v1167_v24 }
 0x572   :  { %v1273_v33 = vpop.f32.mrb[28].mxu0 }
 0x573   :  { %v1274_v34 = vadd.f32 %v1632_v32, %v1273_v33  ;;  %v1866_v35 = vpop.f32.mrb[29].mxu0 }
 0x574   :  { %v1276_v36 = vpop.f32.mrb[30].mxu0 }
 0x575   :  { %2048 = vtanh.f32 %v1274_v34  ;;  %v1867_v37 = vpop.f32.mrb[31].mxu0 }
 0x57f   :  { %v2049_v38 = vpop.eup %2048 }
 0x580   :  { %v1280_v39 = vpack.c.bf16 %v2049_v38, %v2049_v38 }
 0x582   :  { %1877 = vmatmul.mubr.msk.bf16.vlgmr.msra.gmra.mrb[20].mxu1 %vm1313_vm8, %v1280_v39 }
 0x583   :  { %1882 = vmatprep.mubr.msk.f32.mxu1 %vm2078_vm6, %v2077_v42 }
 0x655   :  { %v1351_v44 = vpop.f32.mrb[20].mxu1 }
 0x656   :  { %v1358_v45 = vmul.f32 %v1357_v40, %v1351_v44  ;;  %v1878_v46 = vpop.f32.mrb[21].mxu1 }
 0x657   :  { %v1354_v49 = vpop.f32.mrb[22].mxu1 }
 0x658   :  { %v1879_v52 = vpop.f32.mrb[23].mxu1  ;;  %1881 = vmatpush3.msra.mxu1 %v1358_v45 }
 0x659   :  { %1883 = vmatmul.mubr.msk.f32.vlgmr.msra.gmra.mrb[24].mxu1 %vm1360_vm9, %v1359_v47  ;;  %1920 = vmatprep.subr.bf16.mxu1 %v2079_v53 }
 0x65a   :  { %1922 = vmatpush3.bf16.msra.mxu1 %v1921_v48  ;;  %1917 = vmatprep.mubr.msk.f32.mxu1 %vm2078_vm6, %v2077_v42  ;;  %v1441_v42 = vld [vmem:[%s2591_s12 + $0x38] sm:$0xff]  ;;  %s2052_s12 = scalar_lea.vmem %s1537_s28, 32 }
 0x65b   :  { %1923 = vmatprep.subr.bf16.mxu1 %v2079_v53  ;;  %v1930_v59 = vpack.c.bf16 %v1441_v42, %v1440_v58  ;;  %p2053_p0 = scmp.ne.s32.totalorder %s1537_s28, %s2052_s12  ;;  %p2058_p2 = scmp.lt.s32.totalorder %s2052_s12, %s2052_s12 }
 0x65d   :  { %p2059_p3 = por %p2058_p2, %p2057_p1 }
 0x65e   :  { %1925 = vmatpush3.bf16.msra.mxu1 %v1924_v54 }
 0x65f   :  { %1926 = vmatprep.subr.bf16.mxu1 %v2079_v53  ;;  %p2060_p4 = pnand %p2059_p3, %p2053_p0 }
 0x662   :  { %1928 = vmatpush3.bf16.msra.mxu1 %v1927_v57 }
 0x663   :  { %1929 = vmatprep.subr.bf16.mxu1 %v2079_v53 }
 0x666   :  { %1931 = vmatpush3.bf16.msra.mxu1 %v1930_v59 }
 0x667   :  { %1932 = vmatprep.subr.bf16.mxu1 %v2079_v53 }
 0x66a   :  { %1934 = vmatpush3.bf16.msra.mxu1 %v1933_v62 }
 0x66b   :  { %1935 = vmatprep.subr.bf16.mxu1 %v2079_v53 }
 0x66e   :  { %1937 = vmatpush3.bf16.msra.mxu1 %v1936_v1 }
 0x66f   :  { %1938 = vmatprep.subr.bf16.mxu1 %v2079_v53 }
 0x672   :  { %1940 = vmatpush3.bf16.msra.mxu1 %v1939_v4 }
 0x673   :  { %1941 = vmatprep.subr.bf16.mxu1 %v2079_v53 }
 0x676   :  { %1943 = vmatpush3.bf16.msra.mxu1 %v1942_v7 }
 0x72c   :  { %v1430_v8 = vpop.f32.mrb[24].mxu1 }
 0x72d   :  { %v1884_v9 = vpop.f32.mrb[25].mxu1  ;;  %1918 = vmatmul.mubr.f32.vlgmr.msra.gmra.mrb[26].mxu1 %v1430_v8 }
 0x800   :  { %v1523_v11 = vpop.f32.mrb[26].mxu1 }
 0x801   :  { %v1524_v12 = vadd.f32 %v1647_v10, %v1523_v11  ;;  %v1919_v13 = vpop.f32.mrb[27].mxu1 }
 0x803   :  { %2050 = vtanh.f32 %v1524_v12 }
 0x80d   :  { %v2051_v14 = vpop.eup %2050 }
 0x80e   :  { %1529 = vst.msk [vmem:[#allocation2] sm:$0x3] %vm1528_vm10, %v2051_v14 }
 0x80f   :  { %2063 = shalt.err (!%p2060_p4)
}
 0x810   :  { %s2064_s13 = scalar_lea.hbm %s2593_s14, 32 }
 0x811   :  { %p2065_p5 = scmp.ne.s32.totalorder %s2593_s14, %s2064_s13  ;;  %p2068_p6 = scmp.lt.u32.totalorder %s2064_s13, %s2593_s14 }
 0x813   :  { %p2070_p7 = pnand %p2068_p6, %p2065_p5 }
 0x815   :  { %2073 = shalt.err (!%p2070_p7)
}
 0x816   :  { %1539 = dma.vmem_to_hbm [thread:$0]  %s1537_s28, 32, %s2593_s14, [#allocation3]  }
 0x817   :  { %2074 = dma.done.wait [#allocation3], 32  }
 0x818   :  { %2075 = vsyncadd [#allocation3], 4294967264 }
 0x819   :  { %1543 = vsyncpa [#allocation3], 1 }

</bundles_post_ra>
